<compile_context>
chip_gen: v7x
topology: tpu7x:2x2x1
jax: 0.10.0
libtpu: 0.0.40
codegen_flags: <defaults>
</compile_context>

<pallas_src>
import functools

import jax
import jax.numpy as jnp
from jax.experimental import pallas as pl
from jax.experimental.pallas import tpu as pltpu


H1, H2 = 400, 300      # logical hidden widths (PyTorch module)
H1_PAD = 512           # 400 -> 512: multiple of 128 (v5e MXU) and 256 (v6e/v7x)
LANE = 128
SUBLANE_BF16 = 16      # bf16 packs 16 sublanes per vreg


def _round_up(x, m):
    return (x + m - 1) // m * m


def _default_h2_pad():
    """Generation-aware padding of the 300-wide hidden layer.

    v5e and older have a 128-granular MXU: 300 -> 384 cuts layer-2 N passes
    and layer-3 K passes by 25%.  v6e/v7x MXUs are 256-wide, so 384 and 512
    both take 2 passes -- keep the 256-multiple there.
    """
    try:
        kind = jax.devices()[0].device_kind.lower()
    except Exception:
        return 512
    if "v6" in kind or "v7" in kind:
        return 512
    return 384


def _actor_kernel(state_ref, w1_ref, b1_ref, w2_ref, b2_ref, w3_ref, b3_ref,
                  out_ref, *, max_action):
    # bf16 matmuls with f32 accumulation; f32 element-wise epilogue
    # (v5e VPU/EUP have no bf16 path).
    x = state_ref[...]                                              # bf16 [TB, S_pad]

    h1 = jnp.dot(x, w1_ref[...], preferred_element_type=jnp.float32)
    h1 = jnp.maximum(h1 + b1_ref[...], 0.0)                        # [TB, H1_PAD]

    h2 = jnp.dot(h1.astype(jnp.bfloat16), w2_ref[...],
                 preferred_element_type=jnp.float32)
    h2 = jnp.maximum(h2 + b2_ref[...], 0.0)                        # [TB, H2_PAD]

    h3 = jnp.dot(h2.astype(jnp.bfloat16), w3_ref[...],
                 preferred_element_type=jnp.float32)
    out = jnp.tanh(h3 + b3_ref[...]) * max_action                  # [TB, A_pad]
    out_ref[...] = out.astype(out_ref.dtype)


def prepare_actor_params(params, h2_pad=None):
    """One-time conversion of PyTorch-layout f32 params to kernel layout.

    Transposes (out, in) -> (in, out), zero-pads feature dims (state dim only
    to the bf16 sublane multiple; hidden dims to MXU-friendly widths; action
    dim to a full lane), casts weights to bf16 (MXU operands) and keeps
    biases in f32 (epilogue).  Call once; reuse the result every step.
    """
    w1, b1, w2, b2, w3, b3 = params
    state_dim = w1.shape[1]
    action_dim = w3.shape[0]
    if h2_pad is None:
        h2_pad = _default_h2_pad()
    s_pad = _round_up(state_dim, SUBLANE_BF16)   # bf16 sublane multiple only
    a_pad = _round_up(action_dim, LANE)          # lane-dense output store

    def pack_w(w, in_pad, out_pad):
        wt = jnp.asarray(w, jnp.float32).T
        wt = jnp.pad(wt, ((0, in_pad - wt.shape[0]), (0, out_pad - wt.shape[1])))
        return wt.astype(jnp.bfloat16)

    def pack_b(b, out_pad):
        return jnp.pad(jnp.asarray(b, jnp.float32), (0, out_pad - b.shape[0]))[None, :]

    packed = (pack_w(w1, s_pad, H1_PAD), pack_b(b1, H1_PAD),
              pack_w(w2, H1_PAD, h2_pad), pack_b(b2, h2_pad),
              pack_w(w3, h2_pad, a_pad), pack_b(b3, a_pad))
    return jax.block_until_ready(packed) + (state_dim, action_dim)


def actor_forward(state, prepared, max_action, *, batch_tile=1024,
                  state_buffers=None):
    """state: [B, state_dim] f32 -> action: [B, action_dim] f32.

    NOTE: max_action is baked in via functools.partial; changing it retraces.
    """
    w1, b1, w2, b2, w3, b3, state_dim, action_dim = prepared
    B = state.shape[0]
    s_pad = w1.shape[0]
    a_pad = w3.shape[1]

    # Batch tiling: bf16 sublane multiples.  If more than one tile of rows,
    # guarantee >= 2 grid steps so v7x's second TensorCore is used.
    batch_tile = max(SUBLANE_BF16, (batch_tile // SUBLANE_BF16) * SUBLANE_BF16)
    b_rows = _round_up(max(B, SUBLANE_BF16), SUBLANE_BF16)
    if b_rows > batch_tile:
        tb = min(batch_tile, _round_up(pl.cdiv(b_rows, 2), SUBLANE_BF16))
    else:
        tb = b_rows
    b_pad = _round_up(b_rows, tb)

    # bf16 state stream: single fused cast(+pad); pad skipped when aligned.
    x = state.astype(jnp.bfloat16)
    pad_b, pad_s = b_pad - B, s_pad - state.shape[1]
    if pad_b or pad_s:
        x = jnp.pad(x, ((0, pad_b), (0, pad_s)))

    kernel = functools.partial(_actor_kernel, max_action=float(max_action))

    def resident(shape):
        # Constant block index -> weights/biases stay VMEM-resident across the
        # batch grid (fetched once, reused every iteration).
        return pl.BlockSpec(shape, lambda i: (0, 0))

    state_spec_kwargs = {}
    if state_buffers is not None:
        # Deeper pipeline on the one streamed input (v6e DMA-jitter hiding).
        state_spec_kwargs["pipeline_mode"] = pl.Buffered(int(state_buffers))
    state_spec = pl.BlockSpec((tb, s_pad), lambda i: (i, 0), **state_spec_kwargs)

    out = pl.pallas_call(
        kernel,
        out_shape=jax.ShapeDtypeStruct((b_pad, a_pad), jnp.float32),
        grid=(b_pad // tb,),
        in_specs=[
            state_spec,
            resident(w1.shape), resident(b1.shape),
            resident(w2.shape), resident(b2.shape),
            resident(w3.shape), resident(b3.shape),
        ],
        out_specs=pl.BlockSpec((tb, a_pad), lambda i: (i, 0)),
        compiler_params=pltpu.CompilerParams(
            dimension_semantics=("parallel",)),
    )(x, w1, b1, w2, b2, w3, b3)

    return out[:B, :action_dim]


def init_actor_params(key, state_dim, action_dim):
    """Deterministic synthetic params with PyTorch nn.Linear shapes/init."""
    ks = jax.random.split(key, 6)

    def linear(kw, kb, fan_in, fan_out):
        bound = 1.0 / jnp.sqrt(jnp.float32(fan_in))
        w = jax.random.uniform(kw, (fan_out, fan_in), jnp.float32, -bound, bound)
        b = jax.random.uniform(kb, (fan_out,), jnp.float32, -bound, bound)
        return w, b

    w1, b1 = linear(ks[0], ks[1], state_dim, H1)
    w2, b2 = linear(ks[2], ks[3], H1, H2)
    w3, b3 = linear(ks[4], ks[5], H2, action_dim)
    return (w1, b1, w2, b2, w3, b3)


def actor_reference(state, params, max_action):
    """Pure-JAX f32 reference mirroring the PyTorch forward."""
    w1, b1, w2, b2, w3, b3 = params
    x = jnp.maximum(state @ w1.T + b1, 0.0)
    x = jnp.maximum(x @ w2.T + b2, 0.0)
    return jnp.tanh(x @ w3.T + b3) * max_action


def actor_reference_bf16(state, params, max_action):
    """Reference with the same bf16-matmul / f32-accumulate numerics as the kernel."""
    w1, b1, w2, b2, w3, b3 = params

    def mm(x, w):
        return jax.lax.dot_general(
            x.astype(jnp.bfloat16), w.T.astype(jnp.bfloat16),
            (((1,), (0,)), ((), ())), preferred_element_type=jnp.float32)

    x = jnp.maximum(mm(state, w1) + b1, 0.0)
    x = jnp.maximum(mm(x, w2) + b2, 0.0)
    return jnp.tanh(mm(x, w3) + b3) * max_action


if __name__ == "__main__":
    key = jax.random.PRNGKey(0)
    k_params, k_state, k_big = jax.random.split(key, 3)

    state_dim = 8
    action_dim = 4
    max_action = 2.0

    params = init_actor_params(k_params, state_dim, action_dim)
    prepared = prepare_actor_params(params)   # one-time layout conversion

    # Small-batch check (single grid step).
    batch = 2
    state = jax.random.normal(k_state, (batch, state_dim), jnp.float32)
    out = jax.block_until_ready(actor_forward(state, prepared, max_action))

    ref_bf16 = actor_reference_bf16(state, params, max_action)
    ref_f32 = actor_reference(state, params, max_action)
    assert out.shape == (batch, action_dim)
    assert jnp.allclose(out, ref_bf16, atol=2e-3, rtol=2e-3), \
        "mismatch vs bf16-matmul reference"
    assert jnp.allclose(out, ref_f32, atol=5e-2, rtol=5e-2), \
        "mismatch vs f32 reference"

    # Multi-tile check (exercises the >=2-step parallel batch grid path).
    big_b = 48
    state_big = jax.random.normal(k_big, (big_b, state_dim), jnp.float32)
    out_big = jax.block_until_ready(
        actor_forward(state_big, prepared, max_action, batch_tile=16))
    ref_big = actor_reference_bf16(state_big, params, max_action)
    assert out_big.shape == (big_b, action_dim)
    assert jnp.allclose(out_big, ref_big, atol=2e-3, rtol=2e-3), \
        "multi-tile mismatch vs bf16-matmul reference"

    print("KERNEL_OK")
</pallas_src>

<mosaic_0001>
module attributes {stable_mosaic.version = 11 : i64} {
  func.func @_actor_kernel(%arg0: i32, %arg1: memref<16x16xbf16, #tpu.memory_space<vmem>>, %arg2: memref<16x512xbf16, #tpu.memory_space<vmem>>, %arg3: memref<1x512xf32, #tpu.memory_space<vmem>>, %arg4: memref<512x384xbf16, #tpu.memory_space<vmem>>, %arg5: memref<1x384xf32, #tpu.memory_space<vmem>>, %arg6: memref<384x128xbf16, #tpu.memory_space<vmem>>, %arg7: memref<1x128xf32, #tpu.memory_space<vmem>>, %arg8: memref<16x128xf32, #tpu.memory_space<vmem>>) attributes {dimension_semantics = [#tpu.dimension_semantics<parallel>], iteration_bounds = array<i64: 1>, scalar_prefetch = 0 : i64, scratch_operands = 0 : i64, tpu.core_type = #tpu.core_type<tc>, window_params = [{transform_indices = @transform_0, window_bounds = array<i64: 16, 16>}, {pipeline_mode = #tpu.pipeline_mode<synchronous>, transform_indices = @transform_1, window_bounds = array<i64: 16, 512>}, {pipeline_mode = #tpu.pipeline_mode<synchronous>, transform_indices = @transform_2, window_bounds = array<i64: 1, 512>}, {pipeline_mode = #tpu.pipeline_mode<synchronous>, transform_indices = @transform_3, window_bounds = array<i64: 512, 384>}, {pipeline_mode = #tpu.pipeline_mode<synchronous>, transform_indices = @transform_4, window_bounds = array<i64: 1, 384>}, {pipeline_mode = #tpu.pipeline_mode<synchronous>, transform_indices = @transform_5, window_bounds = array<i64: 384, 128>}, {pipeline_mode = #tpu.pipeline_mode<synchronous>, transform_indices = @transform_6, window_bounds = array<i64: 1, 128>}, {transform_indices = @transform_7, window_bounds = array<i64: 16, 128>}]} {
    %c0 = arith.constant 0 : index
    %c0_0 = arith.constant 0 : index
    %0 = vector.load %arg1[%c0, %c0_0] : memref<16x16xbf16, #tpu.memory_space<vmem>>, vector<16x16xbf16>
    %c0_1 = arith.constant 0 : index
    %c0_2 = arith.constant 0 : index
    %1 = vector.load %arg2[%c0_1, %c0_2] : memref<16x512xbf16, #tpu.memory_space<vmem>>, vector<16x512xbf16>
    %cst = arith.constant dense<0.000000e+00> : vector<16x512xf32>
    %2 = tpu.matmul %0, %1, %cst {dimension_numbers = #tpu.dot_dimension_numbers<[1], [0], [0], [1], [0, 0, 1, 1], [], []>} : vector<16x16xbf16>, vector<16x512xbf16>, vector<16x512xf32> -> vector<16x512xf32>
    %c0_3 = arith.constant 0 : index
    %c0_4 = arith.constant 0 : index
    %3 = vector.load %arg3[%c0_3, %c0_4] : memref<1x512xf32, #tpu.memory_space<vmem>>, vector<1x512xf32>
    %4 = vector.broadcast %3 : vector<1x512xf32> to vector<16x512xf32>
    %5 = arith.addf %2, %4 : vector<16x512xf32>
    %cst_5 = arith.constant 0.000000e+00 : f32
    %6 = vector.broadcast %cst_5 : f32 to vector<16x512xf32>
    %7 = arith.maximumf %5, %6 : vector<16x512xf32>
    %8 = arith.truncf %7 : vector<16x512xf32> to vector<16x512xbf16>
    %c0_6 = arith.constant 0 : index
    %c0_7 = arith.constant 0 : index
    %9 = vector.load %arg4[%c0_6, %c0_7] : memref<512x384xbf16, #tpu.memory_space<vmem>>, vector<512x384xbf16>
    %cst_8 = arith.constant dense<0.000000e+00> : vector<16x384xf32>
    %10 = tpu.matmul %8, %9, %cst_8 {dimension_numbers = #tpu.dot_dimension_numbers<[1], [0], [0], [1], [0, 0, 1, 1], [], []>} : vector<16x512xbf16>, vector<512x384xbf16>, vector<16x384xf32> -> vector<16x384xf32>
    %c0_9 = arith.constant 0 : index
    %c0_10 = arith.constant 0 : index
    %11 = vector.load %arg5[%c0_9, %c0_10] : memref<1x384xf32, #tpu.memory_space<vmem>>, vector<1x384xf32>
    %12 = vector.broadcast %11 : vector<1x384xf32> to vector<16x384xf32>
    %13 = arith.addf %10, %12 : vector<16x384xf32>
    %cst_11 = arith.constant 0.000000e+00 : f32
    %14 = vector.broadcast %cst_11 : f32 to vector<16x384xf32>
    %15 = arith.maximumf %13, %14 : vector<16x384xf32>
    %16 = arith.truncf %15 : vector<16x384xf32> to vector<16x384xbf16>
    %c0_12 = arith.constant 0 : index
    %c0_13 = arith.constant 0 : index
    %17 = vector.load %arg6[%c0_12, %c0_13] : memref<384x128xbf16, #tpu.memory_space<vmem>>, vector<384x128xbf16>
    %cst_14 = arith.constant dense<0.000000e+00> : vector<16x128xf32>
    %18 = tpu.matmul %16, %17, %cst_14 {dimension_numbers = #tpu.dot_dimension_numbers<[1], [0], [0], [1], [0, 0, 1, 1], [], []>} : vector<16x384xbf16>, vector<384x128xbf16>, vector<16x128xf32> -> vector<16x128xf32>
    %c0_15 = arith.constant 0 : index
    %c0_16 = arith.constant 0 : index
    %19 = vector.load %arg7[%c0_15, %c0_16] : memref<1x128xf32, #tpu.memory_space<vmem>>, vector<1x128xf32>
    %20 = vector.broadcast %19 : vector<1x128xf32> to vector<16x128xf32>
    %21 = arith.addf %18, %20 : vector<16x128xf32>
    %22 = math.tanh %21 : vector<16x128xf32>
    %cst_17 = arith.constant 2.000000e+00 : f32
    %23 = vector.broadcast %cst_17 : f32 to vector<16x128xf32>
    %24 = arith.mulf %22, %23 : vector<16x128xf32>
    %c0_18 = arith.constant 0 : index
    %c0_19 = arith.constant 0 : index
    %25 = vector.load %arg8[%c0_18, %c0_19] : memref<16x128xf32, #tpu.memory_space<vmem>>, vector<16x128xf32>
    tpu.vector_store %arg8[%c0_18, %c0_19], %24 {strides = array<i32>} : memref<16x128xf32, #tpu.memory_space<vmem>>, vector<16x128xf32>,
    return
  }
  func.func @transform_0(%arg0: i32) -> (i32, i32) {
    %c0_i32 = arith.constant 0 : i32
    %c0_i32_0 = arith.constant 0 : i32
    return %arg0, %c0_i32 : i32, i32
  }
  func.func @transform_1(%arg0: i32) -> (i32, i32) {
    %c0_i32 = arith.constant 0 : i32
    %c0_i32_0 = arith.constant 0 : i32
    %c0_i32_1 = arith.constant 0 : i32
    return %c0_i32, %c0_i32_0 : i32, i32
  }
  func.func @transform_2(%arg0: i32) -> (i32, i32) {
    %c0_i32 = arith.constant 0 : i32
    %c0_i32_0 = arith.constant 0 : i32
    %c0_i32_1 = arith.constant 0 : i32
    return %c0_i32, %c0_i32_0 : i32, i32
  }
  func.func @transform_3(%arg0: i32) -> (i32, i32) {
    %c0_i32 = arith.constant 0 : i32
    %c0_i32_0 = arith.constant 0 : i32
    %c0_i32_1 = arith.constant 0 : i32
    return %c0_i32, %c0_i32_0 : i32, i32
  }
  func.func @transform_4(%arg0: i32) -> (i32, i32) {
    %c0_i32 = arith.constant 0 : i32
    %c0_i32_0 = arith.constant 0 : i32
    %c0_i32_1 = arith.constant 0 : i32
    return %c0_i32, %c0_i32_0 : i32, i32
  }
  func.func @transform_5(%arg0: i32) -> (i32, i32) {
    %c0_i32 = arith.constant 0 : i32
    %c0_i32_0 = arith.constant 0 : i32
    %c0_i32_1 = arith.constant 0 : i32
    return %c0_i32, %c0_i32_0 : i32, i32
  }
  func.func @transform_6(%arg0: i32) -> (i32, i32) {
    %c0_i32 = arith.constant 0 : i32
    %c0_i32_0 = arith.constant 0 : i32
    %c0_i32_1 = arith.constant 0 : i32
    return %c0_i32, %c0_i32_0 : i32, i32
  }
  func.func @transform_7(%arg0: i32) -> (i32, i32) {
    %c0_i32 = arith.constant 0 : i32
    %c0_i32_0 = arith.constant 0 : i32
    return %arg0, %c0_i32 : i32, i32
  }
}

</mosaic_0001>

<bundles_post_ra>
// kernel: tpu_custom_call.1
= control target key start
LH: loop header
LB: loop body
LE: loop exit
PB: predicated region body
PF: predicated region fallthrough
CT: control target
= control target key end

     0   :  { %12 = vsyncpa [#allocation3], 0  ;;  %s2068_s0 = inlined_call_operand.hbm [shape: bf16[16,16], index: 0, kind: input, shape index: {}]   ;;  %s2069_s1 = inlined_call_operand.hbm [shape: bf16[16,512], index: 1, kind: input, shape index: {}]   ;;  %s2070_s2 = inlined_call_operand.vmem [shape: f32[1,512], index: 2, kind: input, shape index: {}]   ;;  %s2071_s3 = inlined_call_operand.hbm [shape: bf16[512,384], index: 3, kind: input, shape index: {}]   ;;  %s2072_s4 = inlined_call_operand.vmem [shape: f32[1,384], index: 4, kind: input, shape index: {}]   ;;  %s2073_s5 = inlined_call_operand.hbm [shape: bf16[384,128], index: 5, kind: input, shape index: {}]   ;;  %s2074_s6 = inlined_call_operand.vmem [shape: f32[1,128], index: 6, kind: input, shape index: {}]   ;;  %s2075_s7 = inlined_call_operand.hbm [shape: f32[16,128], index: 7, kind: output, shape index: {}]  }
   0x1   :  { %13 = vsyncpa [#allocation6], 0 }
   0x2   :  { %14 = vsyncpa [#allocation9], 0 }
   0x3   :  { %15 = vsyncpa [#allocation4], 0  ;;  %s1906_s24 = smov [#allocation5]   ;;  %s1788_s28 = scalar_lea.hbm %s2069_s1, 512 }
   0x4   :  { %s33_s25 = sshll.u32 %s1906_s24, 4  ;;  %p1789_p0 = scmp.ne.s32.totalorder %s2069_s1, %s1788_s28  ;;  %s34_s25 = int_to_ptr.vmem [resolvable:$true] %s33_s25 }
   0x5   :  { %p1792_p1 = scmp.lt.u32.totalorder %s1788_s28, %s2069_s1 }
   0x7   :  { %p1794_p2 = pnand %p1792_p1, %p1789_p0 }
   0x9   :  { %1797 = shalt.err (!%p1794_p2)
}
   0xa   :  { %s1798_s10 = scalar_lea.vmem %s34_s25, 512  ;;  %p1803_p4 = scmp.lt.s32.totalorder %s34_s25, %s34_s25 }
   0xb   :  { %p1799_p3 = scmp.ne.s32.totalorder %s34_s25, %s1798_s10  ;;  %p1804_p5 = scmp.lt.s32.totalorder %s1798_s10, %s1798_s10 }
   0xd   :  { %p1805_p6 = por %p1804_p5, %p1803_p4 }
   0xf   :  { %p1806_p7 = pnand %p1805_p6, %p1799_p3 }
  0x11   :  { %1809 = shalt.err (!%p1806_p7)
}
  0x12   :  { %s1907_s11 = smov 256   ;;  %s1908_s12 = smov 16  }
  0x13   :  { %39 = dma.hbm_to_vmem [thread:$0]  %s2069_s1, 512, %s34_s25, [#allocation6], %s1907_s11, %s1907_s11, %s1908_s12  }
  0x14   :  { %s1909_s15 = smov [#allocation2]   ;;  %s1810_s19 = scalar_lea.hbm %s2068_s0, 128 }
  0x15   :  { %s21_s16 = sshll.u32 %s1909_s15, 4  ;;  %p1811_p8 = scmp.ne.s32.totalorder %s2068_s0, %s1810_s19  ;;  %s22_s16 = int_to_ptr.vmem [resolvable:$true] %s21_s16 }
  0x16   :  { %p1814_p9 = scmp.lt.u32.totalorder %s1810_s19, %s2068_s0 }
  0x18   :  { %p1816_p10 = pnand %p1814_p9, %p1811_p8 }
  0x1a   :  { %1819 = shalt.err (!%p1816_p10)
}
  0x1b   :  { %s1820_s24 = scalar_lea.vmem %s22_s16, 128  ;;  %p1825_p12 = scmp.lt.s32.totalorder %s22_s16, %s22_s16 }
  0x1c   :  { %p1821_p11 = scmp.ne.s32.totalorder %s22_s16, %s1820_s24  ;;  %p1826_p13 = scmp.lt.s32.totalorder %s1820_s24, %s1820_s24 }
  0x1e   :  { %p1827_p0 = por %p1826_p13, %p1825_p12 }
  0x20   :  { %p1828_p1 = pnand %p1827_p0, %p1821_p11 }
  0x22   :  { %1831 = shalt.err (!%p1828_p1)
}
  0x23   :  { %s1910_s1 = smov 64   ;;  %s1911_s25 = smov 4  }
  0x24   :  { %27 = dma.hbm_to_vmem [thread:$0]  %s2068_s0, 128, %s22_s16, [#allocation3], %s1910_s1, %s1910_s1, %s1911_s25  }
  0x25   :  { %s1912_s28 = smov [#allocation7]   ;;  %s1832_s9 = scalar_lea.hbm %s2071_s3, 12288 }
  0x26   :  { %s47_s29 = sshll.u32 %s1912_s28, 4  ;;  %p1833_p2 = scmp.ne.s32.totalorder %s2071_s3, %s1832_s9  ;;  %s48_s29 = int_to_ptr.vmem [resolvable:$true] %s47_s29 }
  0x27   :  { %p1836_p3 = scmp.lt.u32.totalorder %s1832_s9, %s2071_s3 }
  0x29   :  { %p1838_p4 = pnand %p1836_p3, %p1833_p2 }
  0x2b   :  { %1841 = shalt.err (!%p1838_p4)
}
  0x2c   :  { %s1842_s14 = scalar_lea.vmem %s48_s29, 12288  ;;  %p1847_p6 = scmp.lt.s32.totalorder %s48_s29, %s48_s29 }
  0x2d   :  { %p1843_p5 = scmp.ne.s32.totalorder %s48_s29, %s1842_s14  ;;  %p1848_p7 = scmp.lt.s32.totalorder %s1842_s14, %s1842_s14 }
  0x2f   :  { %p1849_p8 = por %p1848_p7, %p1847_p6 }
  0x31   :  { %p1850_p9 = pnand %p1849_p8, %p1843_p5 }
  0x33   :  { %1853 = shalt.err (!%p1850_p9)
}
  0x34   :  { %s1913_s0 = smov 192   ;;  %s1914_s15 = smov 12  }
  0x35   :  { %53 = dma.hbm_to_vmem [thread:$0]  %s2071_s3, 12288, %s48_s29, [#allocation6], %s1913_s0, %s1913_s0, %s1914_s15  }
  0x36   :  { %s1915_s18 = smov [#allocation8]   ;;  %s1854_s22 = scalar_lea.hbm %s2073_s5, 3072 }
  0x37   :  { %s61_s19 = sshll.u32 %s1915_s18, 4  ;;  %p1855_p10 = scmp.ne.s32.totalorder %s2073_s5, %s1854_s22  ;;  %s62_s19 = int_to_ptr.vmem [resolvable:$true] %s61_s19 }
  0x38   :  { %p1858_p11 = scmp.lt.u32.totalorder %s1854_s22, %s2073_s5 }
  0x3a   :  { %p1860_p12 = pnand %p1858_p11, %p1855_p10 }
  0x3c   :  { %1863 = shalt.err (!%p1860_p12)
}
  0x3d   :  { %s1864_s28 = scalar_lea.vmem %s62_s19, 3072  ;;  %p1869_p0 = scmp.lt.s32.totalorder %s62_s19, %s62_s19 }
  0x3e   :  { %p1865_p13 = scmp.ne.s32.totalorder %s62_s19, %s1864_s28  ;;  %p1870_p1 = scmp.lt.s32.totalorder %s1864_s28, %s1864_s28 }
  0x40   :  { %p1871_p2 = por %p1870_p1, %p1869_p0 }
  0x42   :  { %p1872_p3 = pnand %p1871_p2, %p1865_p13 }
  0x44   :  { %1875 = shalt.err (!%p1872_p3)
}
  0x45   :  { %67 = dma.hbm_to_vmem [thread:$0]  %s2073_s5, 3072, %s62_s19, [#allocation9], %s1910_s1, %s1910_s1, %s1911_s25  }
  0x46   :  { %1898 = dma.done.wait [#allocation3], 128  }
  0x47   :  { %1899 = vsyncadd [#allocation3], 4294967168 }
  0x48   :  { %1900 = dma.done.wait [#allocation6], 12800  }
  0x49   :  { %1901 = vsyncadd [#allocation6], 4294954496 }
  0x4a   :  { %1902 = dma.done.wait [#allocation9], 3072  }
  0x4b   :  { %1903 = vsyncadd [#allocation9], 4294964224  ;;  %v1916_v0 = vmov 0   ;;  %v1625_v1 = vld [vmem:[#allocation5 + $0x4] ss:$16 sps:$4 sm:$0xff]   ;;  %v1628_v3 = vld [vmem:[#allocation2] sm:$0xff]   ;;  %v91_v56 = vlaneseq }
  0x4c   :  { %172 = vmatprep.mubr.bf16.mxu0 %v1916_v0  ;;  %215 = vmatprep.mubr.bf16.mxu1 %v1916_v0  ;;  %v1627_v2 = vld [vmem:[#allocation5] ss:$16 sps:$4 sm:$0xff]   ;;  %vm136_vm0 = vcmask 130048   ;;  %v1629_v4 = vld [vmem:[#allocation5 + $0xc] ss:$16 sps:$4 sm:$0xff]   ;;  %vm1918_vm1 = vmmov 0  }
  0x4d   :  { %140 = vmatprep.subr.bf16.mxu0 %v1625_v1  ;;  %v1631_v5 = vld [vmem:[#allocation5 + $0x8] ss:$16 sps:$4 sm:$0xff]   ;;  %v1632_v6 = vld [vmem:[#allocation7] ss:$12 sps:$4 sm:$0xff]   ;;  %v1634_v7 = vld [vmem:[#allocation7 + $0x4] ss:$12 sps:$4 sm:$0xff]   ;;  %183 = vmatprep.subr.bf16.mxu1 %v1629_v4 }
  0x4e   :  { %141 = vmatpush1.bf16.msra.mxu0 %v1627_v2  ;;  %184 = vmatpush1.bf16.msra.mxu1 %v1631_v5  ;;  %v1637_v8 = vld [vmem:[#allocation7 + $0x1c] ss:$12 sps:$4 sm:$0xff]   ;;  %v1635_v9 = vld [vmem:[#allocation7 + $0x18] ss:$12 sps:$4 sm:$0xff]   ;;  %v1640_v10 = vld [vmem:[#allocation7 + $0x34] ss:$12 sps:$4 sm:$0xff]  }
  0x4f   :  { %895 = vmatprep.subr.bf16.mxu0 %v1634_v7  ;;  %v1638_v11 = vld [vmem:[#allocation7 + $0x30] ss:$12 sps:$4 sm:$0xff]   ;;  %v1643_v12 = vld [vmem:[#allocation7 + $0x4c] ss:$12 sps:$4 sm:$0xff]   ;;  %v1641_v13 = vld [vmem:[#allocation7 + $0x48] ss:$12 sps:$4 sm:$0xff]  }
  0x50   :  { %v1646_v14 = vld [vmem:[#allocation7 + $0x64] ss:$12 sps:$4 sm:$0xff]   ;;  %v1659_v15 = vld [vmem:[#allocation7 + $0xc8] ss:$12 sps:$4 sm:$0xff]   ;;  %v1644_v17 = vld [vmem:[#allocation7 + $0x60] ss:$12 sps:$4 sm:$0xff]  }
  0x51   :  { %1383 = vmatmul.mubr.msk.bf16.vlgmr.msra.gmra.mrb[0].mxu0 %vm136_vm0, %v1628_v3  ;;  %1384 = vmatmul.mubr.msk.bf16.vlgmr.msra.gmra.mrb[0].mxu1 %vm136_vm0, %v1628_v3  ;;  %v1660_v16 = vld [vmem:[#allocation7 + $0x8] ss:$12 sps:$4 sm:$0xff]   ;;  %v1664_v18 = vld [vmem:[#allocation7 + $0xe0] ss:$12 sps:$4 sm:$0xff]   ;;  %v1647_v21 = vld [vmem:[#allocation7 + $0x78] ss:$12 sps:$4 sm:$0xff]  }
  0x52   :  { %896 = vmatpush1.bf16.msra.mxu0 %v1632_v6  ;;  %1506 = vmatprep.subr.bf16.mxu1 %v1659_v15  ;;  %v1665_v19 = vld [vmem:[#allocation7 + $0x20] ss:$12 sps:$4 sm:$0xff]   ;;  %v1649_v20 = vld [vmem:[#allocation7 + $0x7c] ss:$12 sps:$4 sm:$0xff]   ;;  %v1669_v22 = vld [vmem:[#allocation7 + $0xf8] ss:$12 sps:$4 sm:$0xff]  }
  0x53   :  { %897 = vmatprep.subr.bf16.mxu0 %v1637_v8  ;;  %1507 = vmatpush3.bf16.msra.mxu1 %v1660_v16  ;;  %v1670_v23 = vld [vmem:[#allocation7 + $0x38] ss:$12 sps:$4 sm:$0xff]   ;;  %v1652_v24 = vld [vmem:[#allocation7 + $0x94] ss:$12 sps:$4 sm:$0xff]   ;;  %v1674_v25 = vld [vmem:[#allocation7 + $0x110] ss:$12 sps:$4 sm:$0xff]  }
  0x54   :  { %1508 = vmatprep.subr.bf16.mxu1 %v1664_v18  ;;  %v1675_v26 = vld [vmem:[#allocation7 + $0x50] ss:$12 sps:$4 sm:$0xff]   ;;  %v1655_v28 = vld [vmem:[#allocation7 + $0xac] ss:$12 sps:$4 sm:$0xff]   ;;  %v1679_v29 = vld [vmem:[#allocation7 + $0x128] ss:$12 sps:$4 sm:$0xff]  }
  0x55   :  { %v1650_v27 = vld [vmem:[#allocation7 + $0x90] ss:$12 sps:$4 sm:$0xff]   ;;  %v1653_v30 = vld [vmem:[#allocation7 + $0xa8] ss:$12 sps:$4 sm:$0xff]   ;;  %v1684_v33 = vld [vmem:[#allocation7 + $0x140] ss:$12 sps:$4 sm:$0xff]  }
  0x56   :  { %898 = vmatpush1.bf16.msra.mxu0 %v1635_v9  ;;  %v1680_v31 = vld [vmem:[#allocation7 + $0x68] ss:$12 sps:$4 sm:$0xff]   ;;  %v1658_v32 = vld [vmem:[#allocation7 + $0xc4] ss:$12 sps:$4 sm:$0xff]   ;;  %v1656_v34 = vld [vmem:[#allocation7 + $0xc0] ss:$12 sps:$4 sm:$0xff]  }
  0x57   :  { %899 = vmatprep.subr.bf16.mxu0 %v1640_v10  ;;  %1509 = vmatpush3.bf16.msra.mxu1 %v1665_v19  ;;  %v1685_v35 = vld [vmem:[#allocation7 + $0x80] ss:$12 sps:$4 sm:$0xff]   ;;  %v1663_v36 = vld [vmem:[#allocation7 + $0xdc] ss:$12 sps:$4 sm:$0xff]   ;;  %v1661_v37 = vld [vmem:[#allocation7 + $0xd8] ss:$12 sps:$4 sm:$0xff]  }
  0x58   :  { %1510 = vmatprep.subr.bf16.mxu1 %v1669_v22  ;;  %v1668_v38 = vld [vmem:[#allocation7 + $0xf4] ss:$12 sps:$4 sm:$0xff]   ;;  %v1666_v39 = vld [vmem:[#allocation7 + $0xf0] ss:$12 sps:$4 sm:$0xff]   ;;  %v1673_v40 = vld [vmem:[#allocation7 + $0x10c] ss:$12 sps:$4 sm:$0xff]  }
  0x59   :  { %v1671_v41 = vld [vmem:[#allocation7 + $0x108] ss:$12 sps:$4 sm:$0xff]   ;;  %v1678_v42 = vld [vmem:[#allocation7 + $0x124] ss:$12 sps:$4 sm:$0xff]   ;;  %v1676_v43 = vld [vmem:[#allocation7 + $0x120] ss:$12 sps:$4 sm:$0xff]  }
  0x5a   :  { %900 = vmatpush1.bf16.msra.mxu0 %v1638_v11  ;;  %v1683_v44 = vld [vmem:[#allocation7 + $0x13c] ss:$12 sps:$4 sm:$0xff]   ;;  %v1681_v45 = vld [vmem:[#allocation7 + $0x138] ss:$12 sps:$4 sm:$0xff]   ;;  %v1688_v46 = vld [vmem:[#allocation7 + $0x154] ss:$12 sps:$4 sm:$0xff]  }
  0x5b   :  { %901 = vmatprep.subr.bf16.mxu0 %v1643_v12  ;;  %1511 = vmatpush3.bf16.msra.mxu1 %v1670_v23  ;;  %v1689_v47 = vld [vmem:[#allocation7 + $0x158] ss:$12 sps:$4 sm:$0xff]   ;;  %v1686_v48 = vld [vmem:[#allocation7 + $0x150] ss:$12 sps:$4 sm:$0xff]   ;;  %v1691_v52 = vld [vmem:[#allocation7 + $0x168] ss:$12 sps:$4 sm:$0xff]  }
  0x5c   :  { %1512 = vmatprep.subr.bf16.mxu1 %v1674_v25  ;;  %v1690_v49 = vld [vmem:[#allocation7 + $0x98] ss:$12 sps:$4 sm:$0xff]   ;;  %v1694_v51 = vld [vmem:[#allocation7 + $0x170] ss:$12 sps:$4 sm:$0xff]   ;;  %v1699_v55 = vld [vmem:[#allocation7 + $0x248] ss:$12 sps:$4 sm:$0xff]  }
  0x5d   :  { %v1693_v50 = vld [vmem:[#allocation7 + $0x16c] ss:$12 sps:$4 sm:$0xff]   ;;  %v1695_v53 = vld [vmem:[#allocation7 + $0xb0] ss:$12 sps:$4 sm:$0xff]   ;;  %v2016_v57 = vshrl.u32 %v91_v56, 7  ;;  %s1919_s8 = smov [#allocation10]  }
  0x5e   :  { %902 = vmatpush1.bf16.msra.mxu0 %v1641_v13  ;;  %v1698_v54 = vld [vmem:[#allocation7 + $0x184] ss:$12 sps:$4 sm:$0xff]   ;;  %v89_v59 = vld [vmem:[%s2070_s2] sm:$0xf]  ;;  %s1364_s9 = sshll.u32 %s1919_s8, 4  ;;  %s1365_s9 = int_to_ptr.vmem [resolvable:$true] %s1364_s9 }
  0x5f   :  { %903 = vmatprep.subr.bf16.mxu0 %v1646_v14  ;;  %1513 = vmatpush3.bf16.msra.mxu1 %v1675_v26  ;;  %v93_v58 = vsub.s32 0, %v2016_v57  ;;  %v97_v60 = vsub.s32 1, %v2016_v57  ;;  %v101_v61 = vsub.s32 2, %v2016_v57  ;;  %v105_v63 = vsub.s32 3, %v2016_v57  ;;  %v1730_v56 = vld [vmem:[#allocation7 + $0x218] ss:$12 sps:$4 sm:$0xff]   ;;  %p1881_p5 = scmp.lt.s32.totalorder %s1365_s9, %s1365_s9 }
  0x60   :  { %1514 = vmatprep.subr.bf16.mxu1 %v1679_v29  ;;  %v1777_v57 = vld [vmem:[#allocation8 + $0x88] sm:$0xff]  }
  0x61   :  { %v94_v62 = vrot.slane %v89_v59, %v93_v58  ;;  %v98_v0 = vrot.slane %v89_v59, %v97_v60  ;;  %v102_v2 = vrot.slane %v89_v59, %v101_v61  ;;  %v106_v5 = vrot.slane %v89_v59, %v105_v63  ;;  %v1733_v59 = vld [vmem:[#allocation7 + $0x22c] ss:$12 sps:$4 sm:$0xff]   ;;  %v1731_v63 = vld [vmem:[#allocation7 + $0x228] ss:$12 sps:$4 sm:$0xff]  }
  0x62   :  { %904 = vmatpush1.bf16.msra.mxu0 %v1644_v17 }
  0x63   :  { %905 = vmatprep.subr.bf16.mxu0 %v1649_v20  ;;  %1515 = vmatpush3.bf16.msra.mxu1 %v1680_v31  ;;  %v1704_v31 = vld [vmem:[#allocation7 + $0x260] ss:$12 sps:$4 sm:$0xff]  }
  0x64   :  { %1516 = vmatprep.subr.bf16.mxu1 %v1684_v33 }
  0x66   :  { %906 = vmatpush1.bf16.msra.mxu0 %v1647_v21 }
  0x67   :  { %907 = vmatprep.subr.bf16.mxu0 %v1652_v24  ;;  %1517 = vmatpush3.bf16.msra.mxu1 %v1685_v35  ;;  %v1701_v35 = vld [vmem:[#allocation7 + $0x198] ss:$12 sps:$4 sm:$0xff]  }
  0x68   :  { %1518 = vmatprep.subr.bf16.mxu1 %v1689_v47  ;;  %v1716_v47 = vld [vmem:[#allocation7 + $0x1e0] ss:$12 sps:$4 sm:$0xff]  }
  0x6a   :  { %908 = vmatpush1.bf16.msra.mxu0 %v1650_v27  ;;  %v1696_v27 = vld [vmem:[#allocation7 + $0x180] ss:$12 sps:$4 sm:$0xff]  }
  0x6b   :  { %909 = vmatprep.subr.bf16.mxu0 %v1655_v28  ;;  %1519 = vmatpush3.bf16.msra.mxu1 %v1690_v49  ;;  %v1700_v28 = vld [vmem:[#allocation7 + $0x188] ss:$12 sps:$4 sm:$0xff]  }
  0x6c   :  { %1520 = vmatprep.subr.bf16.mxu1 %v1694_v51  ;;  %v1723_v49 = vld [vmem:[#allocation7 + $0x1fc] ss:$12 sps:$4 sm:$0xff]   ;;  %v1721_v51 = vld [vmem:[#allocation7 + $0x1f8] ss:$12 sps:$4 sm:$0xff]  }
  0x6e   :  { %910 = vmatpush1.bf16.msra.mxu0 %v1653_v30  ;;  %v1703_v30 = vld [vmem:[#allocation7 + $0x19c] ss:$12 sps:$4 sm:$0xff]  }
  0x6f   :  { %911 = vmatprep.subr.bf16.mxu0 %v1658_v32  ;;  %1521 = vmatpush3.bf16.msra.mxu1 %v1695_v53  ;;  %v1728_v53 = vld [vmem:[#allocation7 + $0x214] ss:$12 sps:$4 sm:$0xff]  }
  0x70   :  { %1528 = vmatprep.subr.bf16.mxu1 %v1699_v55  ;;  %v1726_v55 = vld [vmem:[#allocation7 + $0x210] ss:$12 sps:$4 sm:$0xff]  }
  0x72   :  { %912 = vmatpush1.bf16.msra.mxu0 %v1656_v34 }
  0x73   :  { %913 = vmatprep.subr.bf16.mxu0 %v1663_v36  ;;  %v1705_v36 = vld [vmem:[#allocation7 + $0x1a0] ss:$12 sps:$4 sm:$0xff]  }
  0x76   :  { %914 = vmatpush1.bf16.msra.mxu0 %v1661_v37  ;;  %v1708_v37 = vld [vmem:[#allocation7 + $0x1b4] ss:$12 sps:$4 sm:$0xff]  }
  0x77   :  { %915 = vmatprep.subr.bf16.mxu0 %v1668_v38  ;;  %v1709_v38 = vld [vmem:[#allocation7 + $0x278] ss:$12 sps:$4 sm:$0xff]  }
  0x7a   :  { %916 = vmatpush1.bf16.msra.mxu0 %v1666_v39  ;;  %v1706_v39 = vld [vmem:[#allocation7 + $0x1b0] ss:$12 sps:$4 sm:$0xff]  }
  0x7b   :  { %917 = vmatprep.subr.bf16.mxu0 %v1673_v40  ;;  %v1710_v40 = vld [vmem:[#allocation7 + $0x1b8] ss:$12 sps:$4 sm:$0xff]  }
  0x7e   :  { %918 = vmatpush1.bf16.msra.mxu0 %v1671_v41  ;;  %v1713_v41 = vld [vmem:[#allocation7 + $0x1cc] ss:$12 sps:$4 sm:$0xff]  }
  0x7f   :  { %919 = vmatprep.subr.bf16.mxu0 %v1678_v42  ;;  %v1714_v42 = vld [vmem:[#allocation7 + $0x290] ss:$12 sps:$4 sm:$0xff]  }
  0x82   :  { %920 = vmatpush1.bf16.msra.mxu0 %v1676_v43  ;;  %v1711_v43 = vld [vmem:[#allocation7 + $0x1c8] ss:$12 sps:$4 sm:$0xff]  }
  0x83   :  { %921 = vmatprep.subr.bf16.mxu0 %v1683_v44  ;;  %v1715_v44 = vld [vmem:[#allocation7 + $0x1d0] ss:$12 sps:$4 sm:$0xff]  }
  0x86   :  { %922 = vmatpush1.bf16.msra.mxu0 %v1681_v45  ;;  %v1718_v45 = vld [vmem:[#allocation7 + $0x1e4] ss:$12 sps:$4 sm:$0xff]  }
  0x87   :  { %923 = vmatprep.subr.bf16.mxu0 %v1688_v46  ;;  %v1719_v46 = vld [vmem:[#allocation7 + $0x2a8] ss:$12 sps:$4 sm:$0xff]  }
  0x8a   :  { %924 = vmatpush1.bf16.msra.mxu0 %v1686_v48  ;;  %v1720_v48 = vld [vmem:[#allocation7 + $0x1e8] ss:$12 sps:$4 sm:$0xff]  }
  0x8b   :  { %925 = vmatprep.subr.bf16.mxu0 %v1693_v50  ;;  %v1724_v50 = vld [vmem:[#allocation7 + $0x2c0] ss:$12 sps:$4 sm:$0xff]  }
  0x8e   :  { %926 = vmatpush1.bf16.msra.mxu0 %v1691_v52  ;;  %v1725_v52 = vld [vmem:[#allocation7 + $0x200] ss:$12 sps:$4 sm:$0xff]  }
  0x8f   :  { %938 = vmatprep.subr.bf16.mxu0 %v1698_v54  ;;  %v1729_v54 = vld [vmem:[#allocation7 + $0x2d8] ss:$12 sps:$4 sm:$0xff]  }
 0x124   :  { %v174_v1 = vpop.f32.mrb[0].mxu0  ;;  %v217_v10 = vpop.f32.mrb[0].mxu1 }
 0x125   :  { %v175_v3 = vadd.f32 %v174_v1, %v94_v62  ;;  %v176_v4 = vpop.f32.mrb[1].mxu0  ;;  %v218_v12 = vadd.f32 %v217_v10, %v102_v2  ;;  %v219_v13 = vpop.f32.mrb[1].mxu1  ;;  %v1738_v1 = vld [vmem:[#allocation7 + $0x244] ss:$12 sps:$4 sm:$0xff]   ;;  %v1748_v10 = vld [vmem:[#allocation7 + $0x2a0] ss:$12 sps:$4 sm:$0xff]  }
 0x126   :  { %v177_v6 = vadd.f32 %v176_v4, %v98_v0  ;;  %v178_v7 = vpop.f32.mrb[2].mxu0  ;;  %v220_v16 = vadd.f32 %v219_v13, %v106_v5  ;;  %v221_v17 = vpop.f32.mrb[2].mxu1  ;;  %v1739_v4 = vld [vmem:[#allocation7 + $0x258] ss:$12 sps:$4 sm:$0xff]   ;;  %v1756_v13 = vld [vmem:[#allocation7 + $0x2d4] ss:$12 sps:$4 sm:$0xff]  }
 0x127   :  { %v179_v8 = vadd.f32 %v178_v7, %v94_v62  ;;  %v180_v9 = vpop.f32.mrb[3].mxu0  ;;  %v226_v14 = vmax.f32 %v175_v3, 0.0  ;;  %v228_v20 = vmax.f32 %v218_v12, 0.0  ;;  %v222_v21 = vadd.f32 %v221_v17, %v102_v2  ;;  %v223_v22 = vpop.f32.mrb[3].mxu1  ;;  %v1734_v62 = vld [vmem:[#allocation7 + $0x2f0] ss:$12 sps:$4 sm:$0xff]  }
 0x128   :  { %v181_v11 = vadd.f32 %v180_v9, %v98_v0  ;;  %v227_v18 = vmax.f32 %v177_v6, 0.0  ;;  %v229_v24 = vmax.f32 %v220_v16, 0.0  ;;  %v224_v25 = vadd.f32 %v223_v22, %v106_v5  ;;  %v1735_v0 = vld [vmem:[#allocation7 + $0x230] ss:$12 sps:$4 sm:$0xff]   ;;  %v1736_v2 = vld [vmem:[#allocation7 + $0x240] ss:$12 sps:$4 sm:$0xff]  }
 0x129   :  { %v230_v15 = vmax.f32 %v179_v8, 0.0  ;;  %v232_v29 = vmax.f32 %v222_v21, 0.0  ;;  %v1741_v3 = vld [vmem:[#allocation7 + $0x25c] ss:$12 sps:$4 sm:$0xff]   ;;  %v1744_v5 = vld [vmem:[#allocation7 + $0x274] ss:$12 sps:$4 sm:$0xff]  }
 0x12a   :  { %v231_v19 = vmax.f32 %v181_v11, 0.0  ;;  %v233_v32 = vmax.f32 %v224_v25, 0.0  ;;  %v1742_v6 = vld [vmem:[#allocation7 + $0x270] ss:$12 sps:$4 sm:$0xff]   ;;  %v1747_v7 = vld [vmem:[#allocation7 + $0x28c] ss:$12 sps:$4 sm:$0xff]  }
 0x12b   :  { %v234_v23 = vpack.c.bf16 %v230_v15, %v226_v14  ;;  %v2031_v33 = vpack.c.bf16 %v232_v29, %v228_v20  ;;  %v1745_v8 = vld [vmem:[#allocation7 + $0x288] ss:$12 sps:$4 sm:$0xff]   ;;  %v1750_v9 = vld [vmem:[#allocation7 + $0x2a4] ss:$12 sps:$4 sm:$0xff]   ;;  %v1759_v15 = vld [vmem:[#allocation7 + $0x2ec] ss:$12 sps:$4 sm:$0xff]  }
 0x12c   :  { %v235_v26 = vpack.c.bf16 %v231_v19, %v227_v18  ;;  %v237_v34 = vpack.c.bf16 %v233_v32, %v229_v24  ;;  %v1753_v11 = vld [vmem:[#allocation7 + $0x2bc] ss:$12 sps:$4 sm:$0xff]   ;;  %v1751_v12 = vld [vmem:[#allocation7 + $0x2b8] ss:$12 sps:$4 sm:$0xff]   ;;  %v1764_v21 = vld [vmem:[#allocation8 + $0x50] sm:$0xff]  }
 0x12d   :  { %v1754_v14 = vld [vmem:[#allocation7 + $0x2d0] ss:$12 sps:$4 sm:$0xff]   ;;  %v1757_v16 = vld [vmem:[#allocation7 + $0x2e8] ss:$12 sps:$4 sm:$0xff]   ;;  %v1760_v17 = vld [vmem:[#allocation8 + $0x40] sm:$0xff]  }
 0x12e   :  { %927 = vmatprep.mubr.bf16.mxu0 %v235_v26  ;;  %1013 = vmatprep.mubr.bf16.mxu1 %v235_v26  ;;  %v1761_v18 = vld [vmem:[#allocation8] sm:$0xff]   ;;  %v1762_v19 = vld [vmem:[#allocation8 + $0x48] sm:$0xff]   ;;  %v1765_v22 = vld [vmem:[#allocation8 + $0x10] sm:$0xff]  }
 0x12f   :  { %928 = vmatmul.mubr.bf16.vlgmr.msra.gmra.mrb[4].mxu0 %v234_v23  ;;  %1014 = vmatmul.mubr.bf16.vlgmr.msra.gmra.mrb[4].mxu1 %v234_v23  ;;  %v1763_v20 = vld [vmem:[#allocation8 + $0x8] sm:$0xff]   ;;  %v1766_v23 = vld [vmem:[#allocation8 + $0x58] sm:$0xff]   ;;  %v1768_v25 = vld [vmem:[#allocation8 + $0x60] sm:$0xff]  }
 0x130   :  { %939 = vmatpush1.bf16.msra.mxu0 %v1696_v27  ;;  %1529 = vmatpush3.bf16.msra.mxu1 %v1700_v28  ;;  %v1767_v24 = vld [vmem:[#allocation8 + $0x18] sm:$0xff]   ;;  %v1769_v26 = vld [vmem:[#allocation8 + $0x20] sm:$0xff]   ;;  %v1770_v27 = vld [vmem:[#allocation8 + $0x68] sm:$0xff]  }
 0x131   :  { %940 = vmatprep.subr.bf16.mxu0 %v1703_v30  ;;  %1530 = vmatprep.subr.bf16.mxu1 %v1704_v31  ;;  %v1771_v28 = vld [vmem:[#allocation8 + $0x28] sm:$0xff]   ;;  %v1772_v29 = vld [vmem:[#allocation8 + $0x70] sm:$0xff]   ;;  %v1774_v31 = vld [vmem:[#allocation8 + $0x78] sm:$0xff]  }
 0x132   :  { %1054 = vmatprep.mubr.bf16.mxu1 %v237_v34  ;;  %970 = vmatprep.mubr.bf16.mxu0 %v237_v34  ;;  %v1773_v30 = vld [vmem:[#allocation8 + $0x30] sm:$0xff]   ;;  %v1775_v32 = vld [vmem:[#allocation8 + $0x38] sm:$0xff]  }
 0x134   :  { %941 = vmatpush1.bf16.msra.mxu0 %v1701_v35  ;;  %1531 = vmatpush3.bf16.msra.mxu1 %v1705_v36 }
 0x135   :  { %942 = vmatprep.subr.bf16.mxu0 %v1708_v37  ;;  %1532 = vmatprep.subr.bf16.mxu1 %v1709_v38 }
 0x138   :  { %943 = vmatpush1.bf16.msra.mxu0 %v1706_v39  ;;  %1533 = vmatpush3.bf16.msra.mxu1 %v1710_v40  ;;  %v366_v40 = vld [vmem:[%s2072_s4] sm:$0x7] }
 0x139   :  { %944 = vmatprep.subr.bf16.mxu0 %v1713_v41  ;;  %1534 = vmatprep.subr.bf16.mxu1 %v1714_v42  ;;  %v379_v41 = vrot.slane %v366_v40, %v101_v61 }
 0x13c   :  { %945 = vmatpush1.bf16.msra.mxu0 %v1711_v43  ;;  %1535 = vmatpush3.bf16.msra.mxu1 %v1715_v44 }
 0x13d   :  { %946 = vmatprep.subr.bf16.mxu0 %v1718_v45  ;;  %1536 = vmatprep.subr.bf16.mxu1 %v1719_v46 }
 0x140   :  { %947 = vmatpush1.bf16.msra.mxu0 %v1716_v47  ;;  %1537 = vmatpush3.bf16.msra.mxu1 %v1720_v48 }
 0x141   :  { %948 = vmatprep.subr.bf16.mxu0 %v1723_v49  ;;  %1538 = vmatprep.subr.bf16.mxu1 %v1724_v50 }
 0x144   :  { %949 = vmatpush1.bf16.msra.mxu0 %v1721_v51  ;;  %1539 = vmatpush3.bf16.msra.mxu1 %v1725_v52 }
 0x145   :  { %950 = vmatprep.subr.bf16.mxu0 %v1728_v53  ;;  %1540 = vmatprep.subr.bf16.mxu1 %v1729_v54 }
 0x148   :  { %951 = vmatpush1.bf16.msra.mxu0 %v1726_v55  ;;  %1541 = vmatpush3.bf16.msra.mxu1 %v1730_v56  ;;  %v371_v55 = vrot.slane %v366_v40, %v93_v58  ;;  %v375_v56 = vrot.slane %v366_v40, %v97_v60  ;;  %v1778_v58 = vld [vmem:[#allocation8 + $0x90] sm:$0xff]   ;;  %v1779_v60 = vld [vmem:[#allocation8 + $0x98] sm:$0xff]  }
 0x149   :  { %952 = vmatprep.subr.bf16.mxu0 %v1733_v59  ;;  %1542 = vmatprep.subr.bf16.mxu1 %v1734_v62 }
 0x14c   :  { %953 = vmatpush1.bf16.msra.mxu0 %v1731_v63  ;;  %1543 = vmatpush3.bf16.msra.mxu1 %v1735_v0 }
 0x14d   :  { %954 = vmatprep.subr.bf16.mxu0 %v1738_v1  ;;  %1550 = vmatprep.subr.bf16.mxu1 %v1760_v17 }
 0x14f   :  { %1055 = vmatmul.mubr.bf16.vlgmr.msra.gmra.mrb[8].mxu1 %v2031_v33 }
 0x150   :  { %955 = vmatpush1.bf16.msra.mxu0 %v1736_v2  ;;  %1551 = vmatpush3.bf16.msra.mxu1 %v1761_v18 }
 0x151   :  { %956 = vmatprep.subr.bf16.mxu0 %v1741_v3  ;;  %1552 = vmatprep.subr.bf16.mxu1 %v1762_v19 }
 0x154   :  { %957 = vmatpush1.bf16.msra.mxu0 %v1739_v4  ;;  %1553 = vmatpush3.bf16.msra.mxu1 %v1763_v20 }
 0x155   :  { %958 = vmatprep.subr.bf16.mxu0 %v1744_v5  ;;  %1554 = vmatprep.subr.bf16.mxu1 %v1764_v21  ;;  %v1481_v21 = vld [vmem:[%s2074_s6] ss:$0 sm:$0xff]  ;;  %s1876_s6 = scalar_lea.vmem %s1365_s9, 256 }
 0x156   :  { %p1877_p4 = scmp.ne.s32.totalorder %s1365_s9, %s1876_s6  ;;  %p1882_p6 = scmp.lt.s32.totalorder %s1876_s6, %s1876_s6 }
 0x158   :  { %959 = vmatpush1.bf16.msra.mxu0 %v1742_v6  ;;  %1555 = vmatpush3.bf16.msra.mxu1 %v1765_v22  ;;  %p1883_p7 = por %p1882_p6, %p1881_p5 }
 0x159   :  { %960 = vmatprep.subr.bf16.mxu0 %v1747_v7  ;;  %1556 = vmatprep.subr.bf16.mxu1 %v1766_v23 }
 0x15a   :  { %p1884_p8 = pnand %p1883_p7, %p1877_p4 }
 0x15c   :  { %961 = vmatpush1.bf16.msra.mxu0 %v1745_v8  ;;  %1557 = vmatpush3.bf16.msra.mxu1 %v1767_v24 }
 0x15d   :  { %962 = vmatprep.subr.bf16.mxu0 %v1750_v9  ;;  %1558 = vmatprep.subr.bf16.mxu1 %v1768_v25 }
 0x160   :  { %963 = vmatpush1.bf16.msra.mxu0 %v1748_v10  ;;  %1559 = vmatpush3.bf16.msra.mxu1 %v1769_v26  ;;  %v1776_v10 = vld [vmem:[#allocation8 + $0x80] sm:$0xff]  }
 0x161   :  { %964 = vmatprep.subr.bf16.mxu0 %v1753_v11  ;;  %1560 = vmatprep.subr.bf16.mxu1 %v1770_v27  ;;  %v1780_v11 = vld [vmem:[#allocation8 + $0xa0] sm:$0xff]  }
 0x164   :  { %965 = vmatpush1.bf16.msra.mxu0 %v1751_v12  ;;  %1561 = vmatpush3.bf16.msra.mxu1 %v1771_v28  ;;  %v1781_v12 = vld [vmem:[#allocation8 + $0xa8] sm:$0xff]  }
 0x165   :  { %966 = vmatprep.subr.bf16.mxu0 %v1756_v13  ;;  %1562 = vmatprep.subr.bf16.mxu1 %v1772_v29  ;;  %v1782_v13 = vld [vmem:[#allocation8 + $0xb0] sm:$0xff]  }
 0x168   :  { %967 = vmatpush1.bf16.msra.mxu0 %v1754_v14  ;;  %1563 = vmatpush3.bf16.msra.mxu1 %v1773_v30  ;;  %v1783_v14 = vld [vmem:[#allocation8 + $0xb8] sm:$0xff]  }
 0x169   :  { %968 = vmatprep.subr.bf16.mxu0 %v1759_v15  ;;  %1564 = vmatprep.subr.bf16.mxu1 %v1774_v31 }
 0x16c   :  { %969 = vmatpush1.bf16.msra.mxu0 %v1757_v16  ;;  %1565 = vmatpush3.bf16.msra.mxu1 %v1775_v32 }
 0x16f   :  { %971 = vmatmul.mubr.bf16.vlgmr.msra.gmra.mrb[4].mxu0 %v2031_v33  ;;  %v1917_v33 = vmov 0.0  }
 0x170   :  { %1581 = vmatprep.subr.bf16.mxu1 %v1917_v33 }
 0x202   :  { %v1522_v34 = vpop.f32.mrb[4].mxu1 }
 0x203   :  { %v1523_v35 = vpop.f32.mrb[5].mxu1 }
 0x204   :  { %v1524_v36 = vadd.f32 %v1523_v35, %v1522_v34  ;;  %v1525_v37 = vpop.f32.mrb[6].mxu1 }
 0x205   :  { %v1526_v38 = vpop.f32.mrb[7].mxu1 }
 0x206   :  { %v1527_v39 = vadd.f32 %v1526_v38, %v1525_v37  ;;  %v1016_v44 = vadd.f32 %v1524_v36, %v379_v41 }
 0x208   :  { %v1019_v48 = vadd.f32 %v1527_v39, %v379_v41 }
 0x222   :  { %v1544_v42 = vpop.f32.mrb[8].mxu1 }
 0x223   :  { %v1545_v43 = vpop.f32.mrb[9].mxu1 }
 0x224   :  { %v1546_v45 = vadd.f32 %v1545_v43, %v1544_v42  ;;  %v1547_v46 = vpop.f32.mrb[10].mxu1 }
 0x225   :  { %v1548_v47 = vpop.f32.mrb[11].mxu1 }
 0x226   :  { %v1057_v49 = vadd.f32 %v1546_v45, %v1016_v44  ;;  %v1549_v50 = vadd.f32 %v1548_v47, %v1547_v46 }
 0x228   :  { %v1060_v51 = vadd.f32 %v1549_v50, %v1019_v48  ;;  %v1065_v52 = vmax.f32 %v1057_v49, 0.0 }
 0x22a   :  { %v1068_v53 = vmax.f32 %v1060_v51, 0.0 }
 0x22c   :  { %v1071_v54 = vpack.c.bf16 %v1068_v53, %v1065_v52 }
 0x242   :  { %v972_v61 = vpop.f32.mrb[4].mxu0 }
 0x243   :  { %v1601_v59 = vadd.f32 %v972_v61, %v371_v55  ;;  %v974_v62 = vpop.f32.mrb[5].mxu0 }
 0x244   :  { %v1602_v63 = vadd.f32 %v974_v62, %v375_v56  ;;  %v976_v0 = vpop.f32.mrb[6].mxu0 }
 0x245   :  { %v1603_v1 = vadd.f32 %v976_v0, %v371_v55  ;;  %v978_v2 = vpop.f32.mrb[7].mxu0  ;;  %v1063_v4 = vmax.f32 %v1601_v59, 0.0 }
 0x246   :  { %v1604_v3 = vadd.f32 %v978_v2, %v375_v56  ;;  %v1064_v6 = vmax.f32 %v1602_v63, 0.0 }
 0x247   :  { %v1066_v5 = vmax.f32 %v1603_v1, 0.0 }
 0x248   :  { %v1067_v7 = vmax.f32 %v1604_v3, 0.0 }
 0x249   :  { %v1069_v8 = vpack.c.bf16 %v1066_v5, %v1063_v4 }
 0x24a   :  { %v1070_v9 = vpack.c.bf16 %v1067_v7, %v1064_v6 }
 0x24c   :  { %1303 = vmatprep.mubr.bf16.mxu1 %v1070_v9 }
 0x24d   :  { %1304 = vmatmul.mubr.bf16.vlgmr.msra.gmra.mrb[12].mxu1 %v1069_v8 }
 0x24e   :  { %1582 = vmatpush3.bf16.msra.mxu1 %v1776_v10  ;;  %1597 = vmatprep.mubr.msk.bf16.mxu1 %vm1918_vm1, %v1917_v33 }
 0x24f   :  { %1583 = vmatprep.subr.bf16.mxu1 %v1917_v33 }
 0x252   :  { %1584 = vmatpush3.bf16.msra.mxu1 %v1777_v57 }
 0x253   :  { %1585 = vmatprep.subr.bf16.mxu1 %v1917_v33 }
 0x256   :  { %1586 = vmatpush3.bf16.msra.mxu1 %v1778_v58 }
 0x257   :  { %1587 = vmatprep.subr.bf16.mxu1 %v1917_v33 }
 0x25a   :  { %1588 = vmatpush3.bf16.msra.mxu1 %v1779_v60 }
 0x25b   :  { %1589 = vmatprep.subr.bf16.mxu1 %v1917_v33 }
 0x25e   :  { %1590 = vmatpush3.bf16.msra.mxu1 %v1780_v11 }
 0x25f   :  { %1591 = vmatprep.subr.bf16.mxu1 %v1917_v33 }
 0x262   :  { %1592 = vmatpush3.bf16.msra.mxu1 %v1781_v12 }
 0x263   :  { %1593 = vmatprep.subr.bf16.mxu1 %v1917_v33 }
 0x266   :  { %1594 = vmatpush3.bf16.msra.mxu1 %v1782_v13 }
 0x267   :  { %1595 = vmatprep.subr.bf16.mxu1 %v1917_v33 }
 0x26a   :  { %1596 = vmatpush3.bf16.msra.mxu1 %v1783_v14 }
 0x26d   :  { %1598 = vmatmul.mubr.bf16.vlgmr.msra.gmra.mrb[16].mxu1 %v1071_v54 }
 0x320   :  { %v1566_v15 = vpop.f32.mrb[12].mxu1 }
 0x321   :  { %v1567_v16 = vpop.f32.mrb[13].mxu1 }
 0x322   :  { %v1568_v17 = vadd.f32 %v1567_v16, %v1566_v15  ;;  %v1569_v18 = vpop.f32.mrb[14].mxu1 }
 0x323   :  { %v1570_v19 = vpop.f32.mrb[15].mxu1 }
 0x324   :  { %v1571_v20 = vadd.f32 %v1570_v19, %v1569_v18  ;;  %v1306_v22 = vadd.f32 %v1568_v17, %v1481_v21 }
 0x326   :  { %v1309_v26 = vadd.f32 %v1571_v20, %v1481_v21 }
 0x340   :  { %v1346_v23 = vpop.f32.mrb[16].mxu1 }
 0x341   :  { %v1347_v24 = vadd.f32 %v1346_v23, %v1306_v22  ;;  %v1599_v25 = vpop.f32.mrb[17].mxu1 }
 0x342   :  { %v1349_v27 = vpop.f32.mrb[18].mxu1 }
 0x343   :  { %1784 = vtanh.f32 %v1347_v24  ;;  %v1350_v28 = vadd.f32 %v1349_v27, %v1309_v26  ;;  %v1600_v29 = vpop.f32.mrb[19].mxu1 }
 0x345   :  { %1786 = vtanh.f32 %v1350_v28 }
 0x34d   :  { %v1785_v30 = vpop.eup %1784 }
 0x34e   :  { %v1355_v31 = vmul.f32 2.0, %v1785_v30 }
 0x34f   :  { %v1787_v32 = vpop.eup %1786 }
 0x350   :  { %1357 = vst [vmem:[#allocation10] sm:$0xff] %v1355_v31  ;;  %v1356_v33 = vmul.f32 2.0, %v1787_v32 }
 0x352   :  { %1358 = vst [vmem:[#allocation10 + $0x8] sm:$0xff] %v1356_v33 }
 0x353   :  { %1887 = shalt.err (!%p1884_p8)
}
 0x354   :  { %s1888_s12 = scalar_lea.hbm %s2075_s7, 256 }
 0x355   :  { %p1889_p9 = scmp.ne.s32.totalorder %s2075_s7, %s1888_s12  ;;  %p1892_p10 = scmp.lt.u32.totalorder %s1888_s12, %s2075_s7 }
 0x357   :  { %p1894_p11 = pnand %p1892_p10, %p1889_p9 }
 0x359   :  { %1897 = shalt.err (!%p1894_p11)
}
 0x35a   :  { %s1920_s16 = smov 128   ;;  %s1921_s17 = smov 8  }
 0x35b   :  { %1370 = dma.vmem_to_hbm [thread:$0]  %s1365_s9, 256, %s2075_s7, [#allocation4], %s1920_s16, %s1920_s16, %s1921_s17  }
 0x35c   :  { %1904 = dma.done.wait [#allocation4], 256  }
 0x35d   :  { %1905 = vsyncadd [#allocation4], 4294967040 }
 0x35e   :  { %1374 = vsyncpa [#allocation3], 1 }
 0x35f   :  { %1375 = vsyncpa [#allocation6], 1 }
 0x360   :  { %1376 = vsyncpa [#allocation9], 1 }
 0x361   :  { %1377 = vsyncpa [#allocation4], 1 }

</bundles_post_ra>
